<compile_context>
chip_gen: v6e
topology: v6e:2x2x1
jax: 0.10.0
libtpu: 0.0.40
codegen_flags: <defaults>
</compile_context>

<pallas_src>
import jax
import jax.numpy as jnp
from jax.experimental import pallas as pl
from jax.experimental.pallas import tpu as pltpu

_LANE_MAX = 1024                      # lane width cap (multiple of 128)
_BLOCK_VMEM_BUDGET = 24 * 1024 * 1024 # resident double-buffered in+out blocks
_VMEM_LIMIT_BYTES = 32 * 1024 * 1024  # explicit scoped-VMEM limit (all gens)


def _silu_f32(x):
    # SiLU(x) = x * sigmoid(x), sigmoid(x) = 0.5 * (tanh(x/2) + 1).
    # Computed in f32 (free at the HBM roofline), cast back to input dtype.
    xf = x.astype(jnp.float32)
    y = xf * (0.5 * (jnp.tanh(xf * 0.5) + 1.0))
    return y.astype(x.dtype)


def _triplane_silu_kernel(xy_ref, xz_ref, yz_ref, oxy_ref, oxz_ref, oyz_ref):
    # Unrolled at trace time: three independent elementwise SiLUs per step.
    for x_ref, o_ref in ((xy_ref, oxy_ref), (xz_ref, oxz_ref), (yz_ref, oyz_ref)):
        o_ref[...] = _silu_f32(x_ref[...])


def _pick_lane(total):
    """Largest multiple-of-128 lane width (<= _LANE_MAX) dividing `total`."""
    lane = _LANE_MAX
    while lane >= 128:
        if total % lane == 0:
            return lane
        lane -= 128
    return None  # total not a multiple of 128 -> caller pads


def triplane_silu(featmaps):
    """featmaps: tuple of three NCHW arrays (tpl_xy, tpl_xz, tpl_yz)."""
    planes = tuple(featmaps)
    assert len(planes) == 3, "expected (tpl_xy, tpl_xz, tpl_yz)"
    dtype = planes[0].dtype
    for p in planes:
        assert p.dtype == dtype, "triplane feature maps must share dtype"

    itemsize = jnp.dtype(dtype).itemsize
    sublane = max(8, 32 // itemsize)  # 8 for f32, 16 for bf16, 32 for int8/fp8

    # --- Flatten each plane to a lane-dense (rows, LANE) slab (free reshape,
    # --- padded only when the element count is not a multiple of 128).
    slabs, meta = [], []
    for p in planes:
        total = p.size
        lane = _pick_lane(total)
        flat = p.reshape(-1)
        pad = 0
        if lane is None:
            pad = (-total) % _LANE_MAX
            flat = jnp.pad(flat, (0, pad))
            lane = _LANE_MAX
        rows = (total + pad) // lane
        slabs.append(flat.reshape(rows, lane))
        meta.append((p.shape, total, lane, rows, pad))

    # --- Grid-step count: enough steps to keep the double-buffered in+out
    # --- blocks under the VMEM budget, at least 2 and even (v7x dual-TC),
    # --- but never more steps than there are minimal blocks of work.
    total_bytes = sum(rows * lane for (_, _, lane, rows, _) in meta) * itemsize
    g_vmem = pl.cdiv(4 * total_bytes, _BLOCK_VMEM_BUDGET)   # 2x buf x (in+out)
    g_useful = max(pl.cdiv(rows, sublane) for (_, _, _, rows, _) in meta)
    if g_useful <= 1:
        grid_steps = 1              # one tiny block: no point splitting
    else:
        grid_steps = max(2, g_vmem)
        if grid_steps % 2:
            grid_steps += 1         # even number of steps for v7x's two TCs
        grid_steps = min(grid_steps, g_useful + (g_useful % 2))

    # --- Per-plane block specs (row tiles rounded to the sublane packing).
    in_specs, out_specs = [], []
    for (_, _, lane, rows, _) in meta:
        block_rows = pl.cdiv(pl.cdiv(rows, grid_steps), sublane) * sublane
        nblk = pl.cdiv(rows, block_rows)
        # Clamp the block index: grid steps past this plane's last block just
        # re-touch it (idempotent for an elementwise map).
        idx = lambda i, last=nblk - 1: (jnp.minimum(i, last), 0)
        spec = pl.BlockSpec((block_rows, lane), idx)
        in_specs.append(spec)
        out_specs.append(spec)

    flat_outs = pl.pallas_call(
        _triplane_silu_kernel,
        out_shape=tuple(jax.ShapeDtypeStruct((rows, lane), dtype)
                        for (_, _, lane, rows, _) in meta),
        grid=(grid_steps,),
        in_specs=in_specs,
        out_specs=tuple(out_specs),
        compiler_params=pltpu.CompilerParams(
            dimension_semantics=("parallel",),
            vmem_limit_bytes=_VMEM_LIMIT_BYTES,
        ),
    )(*slabs)

    # --- Undo flatten/pad (free reshape; the slice only exists if we padded).
    results = []
    for o2d, (shape, total, _, _, pad) in zip(flat_outs, meta):
        flat = o2d.reshape(-1)
        if pad:
            flat = flat[:total]
        results.append(flat.reshape(shape))
    return tuple(results)


def _silu_ref(x):
    return x * jax.nn.sigmoid(x)


if __name__ == "__main__":
    key = jax.random.PRNGKey(0)
    ks = jax.random.split(key, 9)

    # Case 1: typical small triplane feature maps (f32, power-of-two spatial).
    fm1 = (jax.random.normal(ks[0], (2, 4, 16, 16), jnp.float32),
           jax.random.normal(ks[1], (2, 4, 16, 8), jnp.float32),
           jax.random.normal(ks[2], (2, 4, 8, 16), jnp.float32))
    # Case 2: element counts not multiples of 128 (exercises the pad path).
    fm2 = (jax.random.normal(ks[3], (1, 3, 10, 10), jnp.float32),
           jax.random.normal(ks[4], (1, 3, 10, 6), jnp.float32),
           jax.random.normal(ks[5], (1, 3, 6, 10), jnp.float32))
    # Case 3: bf16 (exercises 16-row sublane packing + f32 op-math inside).
    fm3 = (jax.random.normal(ks[6], (2, 8, 32, 32), jnp.float32).astype(jnp.bfloat16),
           jax.random.normal(ks[7], (2, 8, 32, 16), jnp.float32).astype(jnp.bfloat16),
           jax.random.normal(ks[8], (2, 8, 16, 32), jnp.float32).astype(jnp.bfloat16))

    for fms, tol in ((fm1, 1e-5), (fm2, 1e-5), (fm3, 5e-2)):
        outs = jax.block_until_ready(triplane_silu(fms))
        for o, x in zip(outs, fms):
            assert o.shape == x.shape and o.dtype == x.dtype
            ref = _silu_ref(x.astype(jnp.float32))
            err = float(jnp.max(jnp.abs(o.astype(jnp.float32) - ref)))
            assert err < tol, (x.shape, err)

    print("KERNEL_OK")
</pallas_src>

<mosaic_0001>
module attributes {stable_mosaic.version = 11 : i64} {
  func.func @_triplane_silu_kernel(%arg0: i32, %arg1: memref<8x1024xf32, #tpu.memory_space<vmem>>, %arg2: memref<8x1024xf32, #tpu.memory_space<vmem>>, %arg3: memref<8x1024xf32, #tpu.memory_space<vmem>>, %arg4: memref<8x1024xf32, #tpu.memory_space<vmem>>, %arg5: memref<8x1024xf32, #tpu.memory_space<vmem>>, %arg6: memref<8x1024xf32, #tpu.memory_space<vmem>>) attributes {dimension_semantics = [#tpu.dimension_semantics<parallel>], iteration_bounds = array<i64: 1>, scalar_prefetch = 0 : i64, scratch_operands = 0 : i64, tpu.core_type = #tpu.core_type<tc>, window_params = [{transform_indices = @transform_0, window_bounds = array<i64: 8, 1024>}, {transform_indices = @transform_1, window_bounds = array<i64: 8, 1024>}, {transform_indices = @transform_2, window_bounds = array<i64: 8, 1024>}, {transform_indices = @transform_3, window_bounds = array<i64: 8, 1024>}, {transform_indices = @transform_4, window_bounds = array<i64: 8, 1024>}, {transform_indices = @transform_5, window_bounds = array<i64: 8, 1024>}]} {
    %c0 = arith.constant 0 : index
    %c0_0 = arith.constant 0 : index
    %0 = vector.load %arg1[%c0, %c0_0] : memref<8x1024xf32, #tpu.memory_space<vmem>>, vector<8x1024xf32>
    %cst = arith.constant 5.000000e-01 : f32
    %1 = vector.broadcast %cst : f32 to vector<8x1024xf32>
    %2 = arith.mulf %0, %1 : vector<8x1024xf32>
    %3 = math.tanh %2 : vector<8x1024xf32>
    %cst_1 = arith.constant 1.000000e+00 : f32
    %4 = vector.broadcast %cst_1 : f32 to vector<8x1024xf32>
    %5 = arith.addf %3, %4 : vector<8x1024xf32>
    %cst_2 = arith.constant 5.000000e-01 : f32
    %6 = vector.broadcast %cst_2 : f32 to vector<8x1024xf32>
    %7 = arith.mulf %6, %5 : vector<8x1024xf32>
    %8 = arith.mulf %0, %7 : vector<8x1024xf32>
    %c0_3 = arith.constant 0 : index
    %c0_4 = arith.constant 0 : index
    %9 = vector.load %arg4[%c0_3, %c0_4] : memref<8x1024xf32, #tpu.memory_space<vmem>>, vector<8x1024xf32>
    tpu.vector_store %arg4[%c0_3, %c0_4], %8 {strides = array<i32>} : memref<8x1024xf32, #tpu.memory_space<vmem>>, vector<8x1024xf32>,
    %c0_5 = arith.constant 0 : index
    %c0_6 = arith.constant 0 : index
    %10 = vector.load %arg2[%c0_5, %c0_6] : memref<8x1024xf32, #tpu.memory_space<vmem>>, vector<8x1024xf32>
    %cst_7 = arith.constant 5.000000e-01 : f32
    %11 = vector.broadcast %cst_7 : f32 to vector<8x1024xf32>
    %12 = arith.mulf %10, %11 : vector<8x1024xf32>
    %13 = math.tanh %12 : vector<8x1024xf32>
    %cst_8 = arith.constant 1.000000e+00 : f32
    %14 = vector.broadcast %cst_8 : f32 to vector<8x1024xf32>
    %15 = arith.addf %13, %14 : vector<8x1024xf32>
    %cst_9 = arith.constant 5.000000e-01 : f32
    %16 = vector.broadcast %cst_9 : f32 to vector<8x1024xf32>
    %17 = arith.mulf %16, %15 : vector<8x1024xf32>
    %18 = arith.mulf %10, %17 : vector<8x1024xf32>
    %c0_10 = arith.constant 0 : index
    %c0_11 = arith.constant 0 : index
    %19 = vector.load %arg5[%c0_10, %c0_11] : memref<8x1024xf32, #tpu.memory_space<vmem>>, vector<8x1024xf32>
    tpu.vector_store %arg5[%c0_10, %c0_11], %18 {strides = array<i32>} : memref<8x1024xf32, #tpu.memory_space<vmem>>, vector<8x1024xf32>,
    %c0_12 = arith.constant 0 : index
    %c0_13 = arith.constant 0 : index
    %20 = vector.load %arg3[%c0_12, %c0_13] : memref<8x1024xf32, #tpu.memory_space<vmem>>, vector<8x1024xf32>
    %cst_14 = arith.constant 5.000000e-01 : f32
    %21 = vector.broadcast %cst_14 : f32 to vector<8x1024xf32>
    %22 = arith.mulf %20, %21 : vector<8x1024xf32>
    %23 = math.tanh %22 : vector<8x1024xf32>
    %cst_15 = arith.constant 1.000000e+00 : f32
    %24 = vector.broadcast %cst_15 : f32 to vector<8x1024xf32>
    %25 = arith.addf %23, %24 : vector<8x1024xf32>
    %cst_16 = arith.constant 5.000000e-01 : f32
    %26 = vector.broadcast %cst_16 : f32 to vector<8x1024xf32>
    %27 = arith.mulf %26, %25 : vector<8x1024xf32>
    %28 = arith.mulf %20, %27 : vector<8x1024xf32>
    %c0_17 = arith.constant 0 : index
    %c0_18 = arith.constant 0 : index
    %29 = vector.load %arg6[%c0_17, %c0_18] : memref<8x1024xf32, #tpu.memory_space<vmem>>, vector<8x1024xf32>
    tpu.vector_store %arg6[%c0_17, %c0_18], %28 {strides = array<i32>} : memref<8x1024xf32, #tpu.memory_space<vmem>>, vector<8x1024xf32>,
    return
  }
  func.func @transform_0(%arg0: i32) -> (i32, i32) {
    %c0_i32 = arith.constant 0 : i32
    %0 = arith.minsi %arg0, %c0_i32 : i32
    %c0_i32_0 = arith.constant 0 : i32
    %c0_i32_1 = arith.constant 0 : i32
    return %0, %c0_i32_0 : i32, i32
  }
  func.func @transform_1(%arg0: i32) -> (i32, i32) {
    %c0_i32 = arith.constant 0 : i32
    %0 = arith.minsi %arg0, %c0_i32 : i32
    %c0_i32_0 = arith.constant 0 : i32
    %c0_i32_1 = arith.constant 0 : i32
    return %0, %c0_i32_0 : i32, i32
  }
  func.func @transform_2(%arg0: i32) -> (i32, i32) {
    %c0_i32 = arith.constant 0 : i32
    %0 = arith.minsi %arg0, %c0_i32 : i32
    %c0_i32_0 = arith.constant 0 : i32
    %c0_i32_1 = arith.constant 0 : i32
    return %0, %c0_i32_0 : i32, i32
  }
  func.func @transform_3(%arg0: i32) -> (i32, i32) {
    %c0_i32 = arith.constant 0 : i32
    %0 = arith.minsi %arg0, %c0_i32 : i32
    %c0_i32_0 = arith.constant 0 : i32
    %c0_i32_1 = arith.constant 0 : i32
    return %0, %c0_i32_0 : i32, i32
  }
  func.func @transform_4(%arg0: i32) -> (i32, i32) {
    %c0_i32 = arith.constant 0 : i32
    %0 = arith.minsi %arg0, %c0_i32 : i32
    %c0_i32_0 = arith.constant 0 : i32
    %c0_i32_1 = arith.constant 0 : i32
    return %0, %c0_i32_0 : i32, i32
  }
  func.func @transform_5(%arg0: i32) -> (i32, i32) {
    %c0_i32 = arith.constant 0 : i32
    %0 = arith.minsi %arg0, %c0_i32 : i32
    %c0_i32_0 = arith.constant 0 : i32
    %c0_i32_1 = arith.constant 0 : i32
    return %0, %c0_i32_0 : i32, i32
  }
}

</mosaic_0001>

<bundles_post_ra>
// kernel: tpu_custom_call.1
= control target key start
LH: loop header
LB: loop body
LE: loop exit
PB: predicated region body
PF: predicated region fallthrough
CT: control target
= control target key end

     0   :  { %11 = vsyncpa [#allocation3], 0  ;;  %s635_s0 = inlined_call_operand.hbm [shape: f32[2,1024], index: 0, kind: input, shape index: {}]   ;;  %s636_s1 = inlined_call_operand.hbm [shape: f32[1,1024], index: 1, kind: input, shape index: {}]   ;;  %s637_s2 = inlined_call_operand.hbm [shape: f32[1,1024], index: 2, kind: input, shape index: {}]   ;;  %s638_s3 = inlined_call_operand.hbm [shape: f32[2,1024], index: 3, kind: output, shape index: {0}]   ;;  %s639_s4 = inlined_call_operand.hbm [shape: f32[1,1024], index: 4, kind: output, shape index: {1}]   ;;  %s640_s5 = inlined_call_operand.hbm [shape: f32[1,1024], index: 5, kind: output, shape index: {2}]  }
   0x1   :  { %12 = vsyncpa [#allocation6], 0 }
   0x2   :  { %13 = vsyncpa [#allocation4], 0 }
   0x3   :  { %14 = vsyncpa [#allocation10], 0 }
   0x4   :  { %19 = vsyncadd [#allocation3], 768  ;;  %s463_s18 = smov [#allocation2]  }
   0x5   :  { %s20_s19 = sshll.u32 %s463_s18, 4  ;;  %s21_s19 = int_to_ptr.vmem [resolvable:$true] %s20_s19 }
   0x6   :  { %s343_s20 = scalar_lea.vmem %s21_s19, 256  ;;  %s347_s21 = scalar_lea.vmem %s21_s19, 1024 }
   0x7   :  { %p344_p0 = scmp.ne.s32.totalorder %s21_s19, %s343_s20  ;;  %p348_p1 = scmp.lt.s32.totalorder %s21_s19, %s21_s19 }
   0x8   :  { %p349_p2 = scmp.lt.s32.totalorder %s347_s21, %s343_s20 }
   0xa   :  { %p350_p3 = por %p349_p2, %p348_p1 }
   0xc   :  { %p351_p4 = pnand %p350_p3, %p344_p0 }
   0xe   :  { %354 = shalt.err (!%p351_p4)
}
   0xf   :  { %s464_s22 = smov 256   ;;  %s465_s23 = smov 16  }
  0x10   :  { %26 = dma.hbm_to_vmem [thread:$0]  %s635_s0, 256, %s21_s19, [#allocation3], %s464_s22, %s464_s22, %s465_s23  }
  0x11   :  { %31 = vsyncadd [#allocation6], 896  ;;  %s466_s26 = smov [#allocation5]  }
  0x12   :  { %s32_s27 = sshll.u32 %s466_s26, 4  ;;  %s33_s27 = int_to_ptr.vmem [resolvable:$true] %s32_s27 }
  0x13   :  { %s363_s28 = scalar_lea.vmem %s33_s27, 128  ;;  %s367_s29 = scalar_lea.vmem %s33_s27, 1024 }
  0x14   :  { %p364_p5 = scmp.ne.s32.totalorder %s33_s27, %s363_s28  ;;  %p368_p6 = scmp.lt.s32.totalorder %s33_s27, %s33_s27 }
  0x15   :  { %p369_p7 = scmp.lt.s32.totalorder %s367_s29, %s363_s28 }
  0x17   :  { %p370_p8 = por %p369_p7, %p368_p6 }
  0x19   :  { %p371_p9 = pnand %p370_p8, %p364_p5 }
  0x1b   :  { %374 = shalt.err (!%p371_p9)
}
  0x1c   :  { %s467_s30 = smov 128   ;;  %s468_s6 = smov 8  }
  0x1d   :  { %38 = dma.hbm_to_vmem [thread:$0]  %s636_s1, 128, %s33_s27, [#allocation6], %s467_s30, %s467_s30, %s468_s6  }
  0x1e   :  { %43 = vsyncadd [#allocation6], 896  ;;  %s469_s0 = smov [#allocation7]  }
  0x1f   :  { %s44_s9 = sshll.u32 %s469_s0, 4  ;;  %s45_s9 = int_to_ptr.vmem [resolvable:$true] %s44_s9 }
  0x20   :  { %s383_s10 = scalar_lea.vmem %s45_s9, 128  ;;  %s387_s11 = scalar_lea.vmem %s45_s9, 1024 }
  0x21   :  { %p384_p10 = scmp.ne.s32.totalorder %s45_s9, %s383_s10  ;;  %p388_p11 = scmp.lt.s32.totalorder %s45_s9, %s45_s9 }
  0x22   :  { %p389_p12 = scmp.lt.s32.totalorder %s387_s11, %s383_s10 }
  0x24   :  { %p390_p13 = por %p389_p12, %p388_p11 }
  0x26   :  { %p391_p0 = pnand %p390_p13, %p384_p10 }
  0x28   :  { %394 = shalt.err (!%p391_p0)
}
  0x29   :  { %50 = dma.hbm_to_vmem [thread:$0]  %s637_s2, 128, %s45_s9, [#allocation6], %s467_s30, %s467_s30, %s468_s6  }
  0x2a   :  { %455 = dma.done.wait [#allocation3], 1024  }
  0x2b   :  { %456 = vsyncadd [#allocation3], 4294966272 }
  0x2c   :  { %457 = dma.done.wait [#allocation6], 2048  }
  0x2d   :  { %458 = vsyncadd [#allocation6], 4294965248  ;;  %v521_v0 = vld [vmem:[#allocation2] sm:$0xff]  ;;  %v523_v1 = vld [vmem:[#allocation2 + $0x8] sm:$0xff] }
  0x2e   :  { %v525_v2 = vld [vmem:[#allocation2 + $0x10] sm:$0xff]  ;;  %v68_v3 = vmul.f32 0.5, %v521_v0  ;;  %v69_v4 = vmul.f32 0.5, %v523_v1  ;;  %v530_v6 = vld [vmem:[#allocation2 + $0x18] sm:$0xff]  ;;  %v532_v7 = vld [vmem:[#allocation2 + $0x20] sm:$0xff] }
  0x2f   :  { %v70_v5 = vmul.f32 0.5, %v525_v2  ;;  %v534_v8 = vld [vmem:[#allocation2 + $0x28] sm:$0xff]  ;;  %v71_v9 = vmul.f32 0.5, %v530_v6  ;;  %v537_v10 = vld [vmem:[#allocation2 + $0x30] sm:$0xff]  ;;  %v72_v11 = vmul.f32 0.5, %v532_v7  ;;  %v540_v12 = vld [vmem:[#allocation2 + $0x38] sm:$0xff] }
  0x30   :  { %287 = vtanh.f32 %v68_v3  ;;  %v73_v13 = vmul.f32 0.5, %v534_v8  ;;  %v543_v14 = vld [vmem:[#allocation5] sm:$0xff]  ;;  %v74_v15 = vmul.f32 0.5, %v537_v10  ;;  %v546_v16 = vld [vmem:[#allocation5 + $0x8] sm:$0xff]  ;;  %v75_v17 = vmul.f32 0.5, %v540_v12  ;;  %v549_v18 = vld [vmem:[#allocation5 + $0x10] sm:$0xff] }
  0x31   :  { %289 = vtanh.f32 %v69_v4  ;;  %v124_v19 = vmul.f32 0.5, %v543_v14  ;;  %v552_v20 = vld [vmem:[#allocation5 + $0x18] sm:$0xff]  ;;  %v125_v21 = vmul.f32 0.5, %v546_v16  ;;  %v555_v22 = vld [vmem:[#allocation5 + $0x20] sm:$0xff]  ;;  %v126_v23 = vmul.f32 0.5, %v549_v18  ;;  %v558_v24 = vld [vmem:[#allocation5 + $0x28] sm:$0xff] }
  0x32   :  { %291 = vtanh.f32 %v70_v5  ;;  %v127_v25 = vmul.f32 0.5, %v552_v20  ;;  %v561_v26 = vld [vmem:[#allocation5 + $0x30] sm:$0xff]  ;;  %v128_v27 = vmul.f32 0.5, %v555_v22  ;;  %v564_v28 = vld [vmem:[#allocation5 + $0x38] sm:$0xff]  ;;  %v129_v29 = vmul.f32 0.5, %v558_v24  ;;  %v567_v30 = vld [vmem:[#allocation7] sm:$0xff] }
  0x33   :  { %293 = vtanh.f32 %v71_v9  ;;  %v130_v31 = vmul.f32 0.5, %v561_v26  ;;  %v570_v32 = vld [vmem:[#allocation7 + $0x8] sm:$0xff]  ;;  %v131_v33 = vmul.f32 0.5, %v564_v28  ;;  %v573_v34 = vld [vmem:[#allocation7 + $0x10] sm:$0xff]  ;;  %v575_v35 = vld [vmem:[#allocation7 + $0x18] sm:$0xff]  ;;  %v180_v36 = vmul.f32 0.5, %v567_v30 }
  0x34   :  { %295 = vtanh.f32 %v72_v11  ;;  %v578_v37 = vld [vmem:[#allocation7 + $0x20] sm:$0xff]  ;;  %v580_v38 = vld [vmem:[#allocation7 + $0x28] sm:$0xff]  ;;  %v181_v40 = vmul.f32 0.5, %v570_v32  ;;  %v583_v41 = vld [vmem:[#allocation7 + $0x30] sm:$0xff]  ;;  %v182_v44 = vmul.f32 0.5, %v573_v34  ;;  %v183_v45 = vmul.f32 0.5, %v575_v35 }
  0x35   :  { %297 = vtanh.f32 %v73_v13  ;;  %v587_v46 = vld [vmem:[#allocation7 + $0x38] sm:$0xff]  ;;  %v184_v49 = vmul.f32 0.5, %v578_v37  ;;  %v185_v50 = vmul.f32 0.5, %v580_v38  ;;  %v186_v54 = vmul.f32 0.5, %v583_v41 }
  0x36   :  { %299 = vtanh.f32 %v74_v15  ;;  %v187_v58 = vmul.f32 0.5, %v587_v46 }
  0x37   :  { %301 = vtanh.f32 %v75_v17 }
  0x38   :  { %303 = vtanh.f32 %v124_v19 }
  0x39   :  { %305 = vtanh.f32 %v125_v21 }
  0x3a   :  { %307 = vtanh.f32 %v126_v23 }
  0x3b   :  { %309 = vtanh.f32 %v127_v25 }
  0x3c   :  { %311 = vtanh.f32 %v128_v27 }
  0x3d   :  { %v288_v39 = vpop.eup %287  ;;  %313 = vtanh.f32 %v129_v29 }
  0x3e   :  { %v290_v42 = vpop.eup %289  ;;  %v84_v43 = vadd.f32 1.0, %v288_v39  ;;  %315 = vtanh.f32 %v130_v31 }
  0x3f   :  { %v292_v47 = vpop.eup %291  ;;  %v85_v48 = vadd.f32 1.0, %v290_v42  ;;  %317 = vtanh.f32 %v131_v33 }
  0x40   :  { %v294_v51 = vpop.eup %293  ;;  %v92_v52 = vmul.f32 0.5, %v84_v43  ;;  %v86_v53 = vadd.f32 1.0, %v292_v47  ;;  %319 = vtanh.f32 %v180_v36 }
  0x41   :  { %v296_v55 = vpop.eup %295  ;;  %v93_v56 = vmul.f32 0.5, %v85_v48  ;;  %v87_v57 = vadd.f32 1.0, %v294_v51  ;;  %321 = vtanh.f32 %v181_v40 }
  0x42   :  { %v298_v59 = vpop.eup %297  ;;  %v100_v60 = vmul.f32 %v92_v52, %v521_v0  ;;  %v94_v61 = vmul.f32 0.5, %v86_v53  ;;  %v88_v62 = vadd.f32 1.0, %v296_v55  ;;  %323 = vtanh.f32 %v182_v44 }
  0x43   :  { %v300_v63 = vpop.eup %299  ;;  %v101_v3 = vmul.f32 %v93_v56, %v523_v1  ;;  %v95_v4 = vmul.f32 0.5, %v87_v57  ;;  %v89_v5 = vadd.f32 1.0, %v298_v59  ;;  %325 = vtanh.f32 %v183_v45 }
  0x44   :  { %v302_v9 = vpop.eup %301  ;;  %108 = vst [vmem:[#allocation8] sm:$0xff] %v100_v60  ;;  %v102_v11 = vmul.f32 %v94_v61, %v525_v2  ;;  %v96_v13 = vmul.f32 0.5, %v88_v62  ;;  %v90_v15 = vadd.f32 1.0, %v300_v63  ;;  %327 = vtanh.f32 %v184_v49 }
  0x45   :  { %v304_v17 = vpop.eup %303  ;;  %109 = vst [vmem:[#allocation8 + $0x8] sm:$0xff] %v101_v3  ;;  %v103_v0 = vmul.f32 %v95_v4, %v530_v6  ;;  %v97_v19 = vmul.f32 0.5, %v89_v5  ;;  %v91_v21 = vadd.f32 1.0, %v302_v9  ;;  %329 = vtanh.f32 %v185_v50 }
  0x46   :  { %v306_v23 = vpop.eup %305  ;;  %110 = vst [vmem:[#allocation8 + $0x10] sm:$0xff] %v102_v11  ;;  %v104_v1 = vmul.f32 %v96_v13, %v532_v7  ;;  %v98_v25 = vmul.f32 0.5, %v90_v15  ;;  %v140_v27 = vadd.f32 1.0, %v304_v17  ;;  %331 = vtanh.f32 %v186_v54 }
  0x47   :  { %v308_v29 = vpop.eup %307  ;;  %111 = vst [vmem:[#allocation8 + $0x18] sm:$0xff] %v103_v0  ;;  %v105_v2 = vmul.f32 %v97_v19, %v534_v8  ;;  %v99_v31 = vmul.f32 0.5, %v91_v21  ;;  %v141_v33 = vadd.f32 1.0, %v306_v23  ;;  %333 = vtanh.f32 %v187_v58 }
  0x48   :  { %v310_v36 = vpop.eup %309  ;;  %112 = vst [vmem:[#allocation8 + $0x20] sm:$0xff] %v104_v1  ;;  %v106_v6 = vmul.f32 %v98_v25, %v537_v10  ;;  %v148_v39 = vmul.f32 0.5, %v140_v27  ;;  %v142_v40 = vadd.f32 1.0, %v308_v29 }
  0x49   :  { %v312_v42 = vpop.eup %311  ;;  %113 = vst [vmem:[#allocation8 + $0x28] sm:$0xff] %v105_v2  ;;  %v107_v7 = vmul.f32 %v99_v31, %v540_v12  ;;  %v149_v43 = vmul.f32 0.5, %v141_v33  ;;  %v143_v44 = vadd.f32 1.0, %v310_v36 }
  0x4a   :  { %v314_v45 = vpop.eup %313  ;;  %114 = vst [vmem:[#allocation8 + $0x30] sm:$0xff] %v106_v6  ;;  %v156_v47 = vmul.f32 %v148_v39, %v543_v14  ;;  %v150_v8 = vmul.f32 0.5, %v142_v40  ;;  %v144_v48 = vadd.f32 1.0, %v312_v42 }
  0x4b   :  { %v316_v49 = vpop.eup %315  ;;  %115 = vst [vmem:[#allocation8 + $0x38] sm:$0xff] %v107_v7  ;;  %v157_v50 = vmul.f32 %v149_v43, %v546_v16  ;;  %v151_v51 = vmul.f32 0.5, %v143_v44  ;;  %v145_v10 = vadd.f32 1.0, %v314_v45 }
  0x4c   :  { %v318_v52 = vpop.eup %317  ;;  %164 = vst [vmem:[#allocation9] sm:$0xff] %v156_v47  ;;  %v158_v53 = vmul.f32 %v150_v8, %v549_v18  ;;  %v152_v54 = vmul.f32 0.5, %v144_v48  ;;  %v146_v12 = vadd.f32 1.0, %v316_v49 }
  0x4d   :  { %v320_v55 = vpop.eup %319  ;;  %165 = vst [vmem:[#allocation9 + $0x8] sm:$0xff] %v157_v50  ;;  %v159_v56 = vmul.f32 %v151_v51, %v552_v20  ;;  %v153_v57 = vmul.f32 0.5, %v145_v10  ;;  %v147_v14 = vadd.f32 1.0, %v318_v52 }
  0x4e   :  { %v322_v58 = vpop.eup %321  ;;  %166 = vst [vmem:[#allocation9 + $0x10] sm:$0xff] %v158_v53  ;;  %v160_v59 = vmul.f32 %v152_v54, %v555_v22  ;;  %v154_v60 = vmul.f32 0.5, %v146_v12  ;;  %v196_v16 = vadd.f32 1.0, %v320_v55 }
  0x4f   :  { %v324_v61 = vpop.eup %323  ;;  %167 = vst [vmem:[#allocation9 + $0x18] sm:$0xff] %v159_v56  ;;  %v161_v62 = vmul.f32 %v153_v57, %v558_v24  ;;  %v155_v63 = vmul.f32 0.5, %v147_v14  ;;  %v197_v18 = vadd.f32 1.0, %v322_v58 }
  0x50   :  { %v326_v3 = vpop.eup %325  ;;  %168 = vst [vmem:[#allocation9 + $0x20] sm:$0xff] %v160_v59  ;;  %v162_v4 = vmul.f32 %v154_v60, %v561_v26  ;;  %v204_v5 = vmul.f32 0.5, %v196_v16  ;;  %v198_v20 = vadd.f32 1.0, %v324_v61 }
  0x51   :  { %v328_v9 = vpop.eup %327  ;;  %169 = vst [vmem:[#allocation9 + $0x28] sm:$0xff] %v161_v62  ;;  %v163_v11 = vmul.f32 %v155_v63, %v564_v28  ;;  %v205_v13 = vmul.f32 0.5, %v197_v18  ;;  %v199_v22 = vadd.f32 1.0, %v326_v3 }
  0x52   :  { %v330_v15 = vpop.eup %329  ;;  %170 = vst [vmem:[#allocation9 + $0x30] sm:$0xff] %v162_v4  ;;  %v212_v17 = vmul.f32 %v204_v5, %v567_v30  ;;  %v206_v0 = vmul.f32 0.5, %v198_v20  ;;  %v200_v24 = vadd.f32 1.0, %v328_v9 }
  0x53   :  { %v332_v19 = vpop.eup %331  ;;  %171 = vst [vmem:[#allocation9 + $0x38] sm:$0xff] %v163_v11  ;;  %v213_v21 = vmul.f32 %v205_v13, %v570_v32  ;;  %v207_v23 = vmul.f32 0.5, %v199_v22  ;;  %v201_v26 = vadd.f32 1.0, %v330_v15 }
  0x54   :  { %v334_v1 = vpop.eup %333  ;;  %220 = vst [vmem:[#allocation11] sm:$0xff] %v212_v17  ;;  %v214_v25 = vmul.f32 %v206_v0, %v573_v34  ;;  %v208_v27 = vmul.f32 0.5, %v200_v24  ;;  %v202_v28 = vadd.f32 1.0, %v332_v19 }
  0x55   :  { %221 = vst [vmem:[#allocation11 + $0x8] sm:$0xff] %v213_v21  ;;  %v215_v29 = vmul.f32 %v207_v23, %v575_v35  ;;  %v209_v2 = vmul.f32 0.5, %v201_v26  ;;  %v203_v31 = vadd.f32 1.0, %v334_v1 }
  0x56   :  { %222 = vst [vmem:[#allocation11 + $0x10] sm:$0xff] %v214_v25  ;;  %v216_v30 = vmul.f32 %v208_v27, %v578_v37  ;;  %v210_v33 = vmul.f32 0.5, %v202_v28 }
  0x57   :  { %223 = vst [vmem:[#allocation11 + $0x18] sm:$0xff] %v215_v29  ;;  %v217_v32 = vmul.f32 %v209_v2, %v580_v38  ;;  %v211_v36 = vmul.f32 0.5, %v203_v31 }
  0x58   :  { %224 = vst [vmem:[#allocation11 + $0x20] sm:$0xff] %v216_v30  ;;  %v218_v6 = vmul.f32 %v210_v33, %v583_v41 }
  0x59   :  { %225 = vst [vmem:[#allocation11 + $0x28] sm:$0xff] %v217_v32  ;;  %v219_v34 = vmul.f32 %v211_v36, %v587_v46 }
  0x5a   :  { %226 = vst [vmem:[#allocation11 + $0x30] sm:$0xff] %v218_v6 }
  0x5b   :  { %227 = vst [vmem:[#allocation11 + $0x38] sm:$0xff] %v219_v34 }
  0x5c   :  { %232 = vsyncadd [#allocation4], 768  ;;  %s470_s1 = smov [#allocation8]  }
  0x5d   :  { %s233_s2 = sshll.u32 %s470_s1, 4  ;;  %s234_s2 = int_to_ptr.vmem [resolvable:$true] %s233_s2 }
  0x5e   :  { %s395_s14 = scalar_lea.vmem %s234_s2, 256  ;;  %s399_s15 = scalar_lea.vmem %s234_s2, 1024 }
  0x5f   :  { %p396_p1 = scmp.ne.s32.totalorder %s234_s2, %s395_s14  ;;  %p400_p2 = scmp.lt.s32.totalorder %s234_s2, %s234_s2 }
  0x60   :  { %p401_p3 = scmp.lt.s32.totalorder %s399_s15, %s395_s14 }
  0x62   :  { %p402_p4 = por %p401_p3, %p400_p2 }
  0x64   :  { %p403_p5 = pnand %p402_p4, %p396_p1 }
  0x66   :  { %406 = shalt.err (!%p403_p5)
}
  0x67   :  { %239 = dma.vmem_to_hbm [thread:$0]  %s234_s2, 256, %s638_s3, [#allocation4], %s464_s22, %s464_s22, %s465_s23  }
  0x68   :  { %244 = vsyncadd [#allocation10], 896  ;;  %s471_s18 = smov [#allocation9]  }
  0x69   :  { %s245_s19 = sshll.u32 %s471_s18, 4  ;;  %s246_s19 = int_to_ptr.vmem [resolvable:$true] %s245_s19 }
  0x6a   :  { %s415_s20 = scalar_lea.vmem %s246_s19, 128  ;;  %s419_s21 = scalar_lea.vmem %s246_s19, 1024 }
  0x6b   :  { %p416_p6 = scmp.ne.s32.totalorder %s246_s19, %s415_s20  ;;  %p420_p7 = scmp.lt.s32.totalorder %s246_s19, %s246_s19 }
  0x6c   :  { %p421_p8 = scmp.lt.s32.totalorder %s419_s21, %s415_s20 }
  0x6e   :  { %p422_p9 = por %p421_p8, %p420_p7 }
  0x70   :  { %p423_p10 = pnand %p422_p9, %p416_p6 }
  0x72   :  { %426 = shalt.err (!%p423_p10)
}
  0x73   :  { %251 = dma.vmem_to_hbm [thread:$0]  %s246_s19, 128, %s639_s4, [#allocation10], %s467_s30, %s467_s30, %s468_s6  }
  0x74   :  { %256 = vsyncadd [#allocation10], 896  ;;  %s472_s3 = smov [#allocation11]  }
  0x75   :  { %s257_s22 = sshll.u32 %s472_s3, 4  ;;  %s258_s22 = int_to_ptr.vmem [resolvable:$true] %s257_s22 }
  0x76   :  { %s435_s23 = scalar_lea.vmem %s258_s22, 128  ;;  %s439_s26 = scalar_lea.vmem %s258_s22, 1024 }
  0x77   :  { %p436_p11 = scmp.ne.s32.totalorder %s258_s22, %s435_s23  ;;  %p440_p12 = scmp.lt.s32.totalorder %s258_s22, %s258_s22 }
  0x78   :  { %p441_p13 = scmp.lt.s32.totalorder %s439_s26, %s435_s23 }
  0x7a   :  { %p442_p0 = por %p441_p13, %p440_p12 }
  0x7c   :  { %p443_p1 = pnand %p442_p0, %p436_p11 }
  0x7e   :  { %446 = shalt.err (!%p443_p1)
}
  0x7f   :  { %263 = dma.vmem_to_hbm [thread:$0]  %s258_s22, 128, %s640_s5, [#allocation10], %s467_s30, %s467_s30, %s468_s6  }
  0x80   :  { %459 = dma.done.wait [#allocation4], 1024  }
  0x81   :  { %460 = vsyncadd [#allocation4], 4294966272 }
  0x82   :  { %461 = dma.done.wait [#allocation10], 2048  }
  0x83   :  { %462 = vsyncadd [#allocation10], 4294965248 }
  0x84   :  { %273 = vsyncpa [#allocation3], 1 }
  0x85   :  { %274 = vsyncpa [#allocation6], 1 }
  0x86   :  { %275 = vsyncpa [#allocation4], 1 }
  0x87   :  { %276 = vsyncpa [#allocation10], 1 }

</bundles_post_ra>
